<compile_context>
chip_gen: v6e
topology: v6e:2x2x1
jax: 0.10.0
libtpu: 0.0.40
codegen_flags: <defaults>
</compile_context>

<pallas_src>
import functools

import jax
import jax.numpy as jnp
from jax.experimental import pallas as pl
from jax.experimental.pallas import tpu as pltpu


def _round_up(x, m):
    return (x + m - 1) // m * m


# -----------------------------------------------------------------------------
# Kernel 1: fused cls+box point-MLP heads (make_fc_layers, fc_cfg of length 2)
#   Channel-major throughout: x_cm (c_in, tile_n)  ->  W1t @ x (+shift, ReLU)
#   -> W2t(block-diag) @ h (+shift, ReLU) -> Wot @ h  ->  o (out_rows, tile_n).
#   Hidden matmuls in bf16 (f32 accumulation); final matmul in f32.
# -----------------------------------------------------------------------------
def _fused_head_kernel(x_ref, w1_ref, b1_ref, w2_ref, b2_ref, wo_ref, o_ref):
    x = x_ref[...].astype(jnp.bfloat16)                              # (c_in, T)
    h = jnp.dot(w1_ref[...], x, preferred_element_type=jnp.float32)  # (h1, T)
    h = jnp.maximum(h + b1_ref[...], 0.0)                            # BN shift + ReLU
    h = jnp.dot(w2_ref[...], h.astype(jnp.bfloat16),
                preferred_element_type=jnp.float32)                  # (h2, T)
    h = jnp.maximum(h + b2_ref[...], 0.0)                            # BN shift + ReLU
    # final matmul kept in f32 (box-head precision); output is lane-dense
    o_ref[...] = jnp.dot(wo_ref[...], h,
                         preferred_element_type=jnp.float32).astype(o_ref.dtype)


def fused_point_heads_cm(x_cm, fp, *, tile_n=8192):
    """x_cm: (C_in, N) f32, channel-major.  fp: fused transposed params.

    Returns the fused head output as a lane-dense (out_rows, N) f32 slab:
    rows [0:num_class] are the cls logits, rows [num_class:num_class+code]
    are the box regressions, remaining rows are zero padding.
    """
    c_in, n = x_cm.shape
    h1 = fp["w1t"].shape[0]
    h2 = fp["w2t"].shape[0]
    out_rows = fp["wot"].shape[0]
    assert fp["w1t"].shape[1] == c_in

    # lane tile: multiple of 128; keep the grid >= 2 steps when possible so
    # both v7x TensorCores get work via the "parallel" grid axis.
    tile_n = max(128, min(tile_n, _round_up(pl.cdiv(n, 2), 128)))
    grid = (pl.cdiv(n, tile_n),)

    full = lambda i: (0, 0)
    grid_spec = pltpu.PrefetchScalarGridSpec(
        num_scalar_prefetch=0,
        grid=grid,
        in_specs=[
            pl.BlockSpec((c_in, tile_n), lambda i: (0, i)),
            pl.BlockSpec((h1, c_in), full),
            pl.BlockSpec((h1, 1), full),
            pl.BlockSpec((h2, h1), full),
            pl.BlockSpec((h2, 1), full),
            pl.BlockSpec((out_rows, h2), full),
        ],
        out_specs=pl.BlockSpec((out_rows, tile_n), lambda i: (0, i)),
    )
    out = pl.pallas_call(
        _fused_head_kernel,
        out_shape=jax.ShapeDtypeStruct((out_rows, n), jnp.float32),
        grid_spec=grid_spec,
        compiler_params=pltpu.CompilerParams(
            dimension_semantics=("parallel",),
            # large-tile double-buffered footprint (<~20 MB at tile_n=8192);
            # 48 MiB is safe on every generation (v7x physical VMEM = 64 MiB).
            vmem_limit_bytes=48 * 1024 * 1024,
        ),
    )(x_cm, fp["w1t"], fp["b1t"], fp["w2t"], fp["b2t"], fp["wot"])
    return out


def point_head_forward(x, fused_params, num_class, box_code_size, *, tile_n=8192):
    """Runs the fused cls+box heads.

    x: (N, C_in) f32 point features (module convention).
    Returns channel-major (cls_t (num_class, N), box_t (code, N)); transpose
    for the module's (N, C) convention if needed.
    """
    # TODO(synk): have the upstream feature producer emit (C_in, N) directly so
    # this host-side transpose (layout plumbing only) disappears.
    out_t = fused_point_heads_cm(jnp.transpose(x), fused_params, tile_n=tile_n)
    cls_t = out_t[:num_class]
    box_t = out_t[num_class:num_class + box_code_size]
    return cls_t, box_t


# -----------------------------------------------------------------------------
# Kernel 2: get_cls_layer_loss — sigmoid focal classification loss (scalar)
#   Lane-dense layout: preds (num_class, N), labels (1, N), points on lanes.
#   Gridded accumulate-then-finalize: partial loss sum and positive count live
#   in VMEM scratch; division by max(pos,1) and loss weight applied on the
#   last step.  Ragged-tail lanes are masked in-kernel (no host padding).
# -----------------------------------------------------------------------------
def _cls_loss_kernel(preds_ref, labels_ref, out_ref, loss_acc, pos_acc, *,
                     alpha, gamma, point_cls_weight, n_valid, tile_n):
    i = pl.program_id(0)

    @pl.when(i == 0)
    def _():
        loss_acc[...] = jnp.zeros_like(loss_acc)
        pos_acc[...] = jnp.zeros_like(pos_acc)

    preds = preds_ref[...]                       # (num_class, tile) f32 logits
    labels = labels_ref[...]                     # (1, tile) int32 in {-1,0,1..C}

    # mask lanes past N (ragged last block reads undefined data)
    lane = jax.lax.broadcasted_iota(jnp.int32, labels.shape, 1) + i * tile_n
    valid = lane < n_valid
    labels = jnp.where(valid, labels, -1)
    preds = jnp.where(valid, preds, 0.0)

    positives = (labels > 0).astype(jnp.float32)      # (1, tile)
    negatives = (labels == 0).astype(jnp.float32)
    cls_weights = positives + negatives                # unnormalized weights

    # one-hot over classes 1..num_class on the sublane axis (column 0 of the
    # (C+1)-wide one-hot is dropped in the reference; labels<=0 -> zero column)
    cls_idx = jax.lax.broadcasted_iota(jnp.int32, preds.shape, 0) + 1
    one_hot = (labels == cls_idx).astype(jnp.float32)  # (num_class, tile)

    pred_sigmoid = jax.nn.sigmoid(preds)
    alpha_weight = one_hot * alpha + (1.0 - one_hot) * (1.0 - alpha)
    pt = one_hot * (1.0 - pred_sigmoid) + (1.0 - one_hot) * pred_sigmoid
    pt_pow = pt * pt if gamma == 2.0 else pt ** gamma   # gamma==2 stays off EUP
    focal_weight = alpha_weight * pt_pow
    # numerically-stable BCE-with-logits (same formula as pcdet loss_utils)
    bce = (jnp.maximum(preds, 0.0) - preds * one_hot
           + jnp.log1p(jnp.exp(-jnp.abs(preds))))

    loss_acc[...] += jnp.sum(focal_weight * bce * cls_weights)
    pos_acc[...] += jnp.sum(positives)

    @pl.when(i == pl.num_programs(0) - 1)
    def _():
        out_ref[...] = (loss_acc[...] / jnp.maximum(pos_acc[...], 1.0)
                        * point_cls_weight)


def cls_layer_loss(point_cls_preds_t, point_cls_labels, *, num_class,
                   point_cls_weight=1.0, alpha=0.25, gamma=2.0, tile_n=8192):
    """point_cls_preds_t: (num_class, N) f32 logits (as produced by the
    forward kernel); point_cls_labels: (N,) int32 in {-1, 0, 1..num_class}."""
    c, n = point_cls_preds_t.shape
    assert c == num_class
    tile_n = max(128, min(tile_n, _round_up(n, 128)))
    grid = (pl.cdiv(n, tile_n),)

    preds = point_cls_preds_t.astype(jnp.float32)
    labels = point_cls_labels.reshape(1, -1).astype(jnp.int32)

    kernel = functools.partial(_cls_loss_kernel, alpha=alpha, gamma=gamma,
                               point_cls_weight=point_cls_weight,
                               n_valid=n, tile_n=tile_n)
    grid_spec = pltpu.PrefetchScalarGridSpec(
        num_scalar_prefetch=0,
        grid=grid,
        in_specs=[
            pl.BlockSpec((num_class, tile_n), lambda i: (0, i)),
            pl.BlockSpec((1, tile_n), lambda i: (0, i)),
        ],
        out_specs=pl.BlockSpec((1, 1), lambda i: (0, 0)),
        scratch_shapes=[pltpu.VMEM((1, 1), jnp.float32),
                        pltpu.VMEM((1, 1), jnp.float32)],
    )
    out = pl.pallas_call(
        kernel,
        out_shape=jax.ShapeDtypeStruct((1, 1), jnp.float32),
        grid_spec=grid_spec,
        compiler_params=pltpu.CompilerParams(dimension_semantics=("arbitrary",)),
    )(preds, labels)
    return out[0, 0]


# -----------------------------------------------------------------------------
# Parameter construction + host-side fusion.
#   make_head_params: deterministic params matching make_fc_layers shapes
#     (Linear no-bias -> BatchNorm1d folded in eval mode -> ReLU) x 2 + Linear.
#   fuse_head_params: fold BN scale into weights, transpose everything to
#     channel-major, fuse cls+box heads (concat / block-diag), pad the output
#     projection rows to a multiple of 8 sublanes; hidden weights in bf16,
#     output projection kept in f32.
# -----------------------------------------------------------------------------
def make_head_params(key, c_in, fc_cfg, c_out, eps=1e-5):
    assert len(fc_cfg) == 2, "specialized for fc_cfg of length 2"
    h1, h2 = fc_cfg
    k = jax.random.split(key, 5)

    def lin(k_, ci, co):
        return jax.random.normal(k_, (ci, co), jnp.float32) / jnp.sqrt(ci)

    def bn_fold(k_, c):
        kg, kb, km, kv = jax.random.split(k_, 4)
        gamma = 1.0 + 0.1 * jax.random.normal(kg, (1, c), jnp.float32)
        beta = 0.1 * jax.random.normal(kb, (1, c), jnp.float32)
        mean = 0.1 * jax.random.normal(km, (1, c), jnp.float32)
        var = jnp.abs(jax.random.normal(kv, (1, c), jnp.float32)) + 0.5
        scale = gamma / jnp.sqrt(var + eps)
        shift = beta - mean * scale
        return scale, shift

    s1, b1 = bn_fold(k[1], h1)
    s2, b2 = bn_fold(k[3], h2)
    return {"w1": lin(k[0], c_in, h1), "s1": s1, "b1": b1,
            "w2": lin(k[2], h1, h2), "s2": s2, "b2": b2,
            "wo": lin(k[4], h2, c_out)}


def fuse_head_params(cls_p, box_p, num_class, box_code_size, *,
                     mxu_dtype=jnp.bfloat16):
    # Fold BN scale into the preceding linear weights (x@W*s == x@(W*s)), then
    # transpose to channel-major (out_channels, in_channels) for W @ x kernels.
    w1a = (cls_p["w1"] * cls_p["s1"]).T          # (h1a, c_in)
    w1b = (box_p["w1"] * box_p["s1"]).T
    w2a = (cls_p["w2"] * cls_p["s2"]).T          # (h2a, h1a)
    w2b = (box_p["w2"] * box_p["s2"]).T
    h2a, h1a = w2a.shape
    h2b, h1b = w2b.shape
    out_ch = num_class + box_code_size
    out_rows = max(8, _round_up(out_ch, 8))      # sublane-padded output rows

    w1t = jnp.concatenate([w1a, w1b], axis=0)                      # (h1a+h1b, c_in)
    b1t = jnp.concatenate([cls_p["b1"], box_p["b1"]], axis=1).T    # (h1a+h1b, 1)
    w2t = jnp.zeros((h2a + h2b, h1a + h1b), jnp.float32)
    w2t = w2t.at[:h2a, :h1a].set(w2a).at[h2a:, h1a:].set(w2b)      # block-diag
    b2t = jnp.concatenate([cls_p["b2"], box_p["b2"]], axis=1).T    # (h2a+h2b, 1)
    wot = jnp.zeros((out_rows, h2a + h2b), jnp.float32)            # lane-dense out
    wot = wot.at[:num_class, :h2a].set(cls_p["wo"].T)
    wot = wot.at[num_class:out_ch, h2a:].set(box_p["wo"].T)

    return {"w1t": w1t.astype(mxu_dtype), "b1t": b1t,
            "w2t": w2t.astype(mxu_dtype), "b2t": b2t,
            "wot": wot}      # wot stays f32: final matmul in f32 for precision


# TODO(synk): assign_stack_targets / assign_aux_targets / generate_predicted_boxes
# depend on roiaware_pool3d points-in-boxes CUDA ops and an external box_coder;
# no clean Pallas equivalent, so they are not reproduced here.

if __name__ == "__main__":
    key = jax.random.PRNGKey(0)
    N, C_IN = 300, 32           # deliberately NOT a multiple of the tile size
    FC_CFG = [64, 64]
    NUM_CLASS = 3
    BOX_CODE_SIZE = 8

    k_feat, k_cls, k_box, k_lab = jax.random.split(key, 4)
    point_features = jax.random.normal(k_feat, (N, C_IN), jnp.float32)

    cls_params = make_head_params(k_cls, C_IN, FC_CFG, NUM_CLASS)
    box_params = make_head_params(k_box, C_IN, FC_CFG, BOX_CODE_SIZE)
    fused_params = fuse_head_params(cls_params, box_params, NUM_CLASS,
                                    BOX_CODE_SIZE)

    # forward hot path of a concrete PointHead: fused cls + box MLP heads
    cls_t, box_t = point_head_forward(point_features, fused_params,
                                      NUM_CLASS, BOX_CODE_SIZE, tile_n=8192)

    # synthetic target labels in {-1, 0, 1..NUM_CLASS}
    point_cls_labels = jax.random.randint(k_lab, (N,), -1, NUM_CLASS + 1,
                                          dtype=jnp.int32)
    # cls logits feed the loss kernel in the same channel-major layout
    loss_cls = cls_layer_loss(cls_t, point_cls_labels,
                              num_class=NUM_CLASS, point_cls_weight=1.0)

    jax.block_until_ready((cls_t, box_t, loss_cls))

    # module-convention (N, C) views for the semantic checks
    point_cls_preds = jnp.transpose(cls_t)       # (N, num_class)
    point_box_preds = jnp.transpose(box_t)       # (N, box_code_size)

    # ---- correctness checks against plain-JAX references -------------------
    # (a) reference that mimics the kernel's mixed bf16/f32 math exactly
    def ref_heads_cm(x, fp):
        f32 = lambda a: a.astype(jnp.float32)
        xt = f32(jnp.transpose(x).astype(jnp.bfloat16))
        h = jnp.maximum(f32(fp["w1t"]) @ xt + fp["b1t"], 0.0)
        h = jnp.maximum(f32(fp["w2t"]) @ f32(h.astype(jnp.bfloat16)) + fp["b2t"], 0.0)
        return fp["wot"] @ h                      # final matmul in f32

    ref_slab = ref_heads_cm(point_features, fused_params)
    assert jnp.allclose(cls_t, ref_slab[:NUM_CLASS], atol=1e-2, rtol=1e-2)
    assert jnp.allclose(box_t, ref_slab[NUM_CLASS:NUM_CLASS + BOX_CODE_SIZE],
                        atol=1e-2, rtol=1e-2)

    # (b) semantic sanity vs the original per-head f32 math (bf16 hidden
    #     matmuls in the kernel -> loose tolerance)
    def ref_mlp_f32(x, p):
        h = jnp.maximum(x @ p["w1"] * p["s1"] + p["b1"], 0.0)
        h = jnp.maximum(h @ p["w2"] * p["s2"] + p["b2"], 0.0)
        return h @ p["wo"]

    assert jnp.allclose(point_cls_preds, ref_mlp_f32(point_features, cls_params),
                        atol=1e-1, rtol=1e-1)
    assert jnp.allclose(point_box_preds, ref_mlp_f32(point_features, box_params),
                        atol=1e-1, rtol=1e-1)

    # (c) focal-loss reference (same math as pcdet get_cls_layer_loss)
    def ref_loss(preds, labels):
        positives = (labels > 0).astype(jnp.float32)
        negatives = (labels == 0).astype(jnp.float32)
        cls_w = (positives + negatives) / jnp.maximum(positives.sum(), 1.0)
        one_hot = jax.nn.one_hot(jnp.where(labels >= 0, labels, 0),
                                 NUM_CLASS + 1)[:, 1:]
        ps = jax.nn.sigmoid(preds)
        aw = one_hot * 0.25 + (1.0 - one_hot) * 0.75
        pt = one_hot * (1.0 - ps) + (1.0 - one_hot) * ps
        bce = (jnp.maximum(preds, 0.0) - preds * one_hot
               + jnp.log1p(jnp.exp(-jnp.abs(preds))))
        return jnp.sum(aw * pt * pt * bce * cls_w[:, None])

    ref_l = ref_loss(point_cls_preds, point_cls_labels)
    assert jnp.allclose(loss_cls, ref_l, atol=1e-4, rtol=1e-4)
    assert jnp.isfinite(loss_cls)

    print("KERNEL_OK")
</pallas_src>

<mosaic_0001>
module attributes {stable_mosaic.version = 11 : i64} {
  func.func @_fused_head_kernel(%arg0: i32, %arg1: memref<32x256xf32, #tpu.memory_space<vmem>>, %arg2: memref<128x32xbf16, #tpu.memory_space<vmem>>, %arg3: memref<128x1xf32, #tpu.memory_space<vmem>>, %arg4: memref<128x128xbf16, #tpu.memory_space<vmem>>, %arg5: memref<128x1xf32, #tpu.memory_space<vmem>>, %arg6: memref<16x128xf32, #tpu.memory_space<vmem>>, %arg7: memref<16x256xf32, #tpu.memory_space<vmem>>) attributes {dimension_semantics = [#tpu.dimension_semantics<parallel>], iteration_bounds = array<i64: 2>, scalar_prefetch = 0 : i64, scratch_operands = 0 : i64, tpu.core_type = #tpu.core_type<tc>, window_params = [{transform_indices = @transform_0, window_bounds = array<i64: 32, 256>}, {pipeline_mode = #tpu.pipeline_mode<synchronous>, transform_indices = @transform_1, window_bounds = array<i64: 128, 32>}, {pipeline_mode = #tpu.pipeline_mode<synchronous>, transform_indices = @transform_2, window_bounds = array<i64: 128, 1>}, {pipeline_mode = #tpu.pipeline_mode<synchronous>, transform_indices = @transform_3, window_bounds = array<i64: 128, 128>}, {pipeline_mode = #tpu.pipeline_mode<synchronous>, transform_indices = @transform_4, window_bounds = array<i64: 128, 1>}, {pipeline_mode = #tpu.pipeline_mode<synchronous>, transform_indices = @transform_5, window_bounds = array<i64: 16, 128>}, {transform_indices = @transform_6, window_bounds = array<i64: 16, 256>}]} {
    %c0 = arith.constant 0 : index
    %c0_0 = arith.constant 0 : index
    %0 = vector.load %arg1[%c0, %c0_0] : memref<32x256xf32, #tpu.memory_space<vmem>>, vector<32x256xf32>
    %1 = arith.truncf %0 : vector<32x256xf32> to vector<32x256xbf16>
    %c0_1 = arith.constant 0 : index
    %c0_2 = arith.constant 0 : index
    %2 = vector.load %arg2[%c0_1, %c0_2] : memref<128x32xbf16, #tpu.memory_space<vmem>>, vector<128x32xbf16>
    %cst = arith.constant dense<0.000000e+00> : vector<128x256xf32>
    %3 = tpu.matmul %2, %1, %cst {dimension_numbers = #tpu.dot_dimension_numbers<[1], [0], [0], [1], [0, 0, 1, 1], [], []>} : vector<128x32xbf16>, vector<32x256xbf16>, vector<128x256xf32> -> vector<128x256xf32>
    %c0_3 = arith.constant 0 : index
    %c0_4 = arith.constant 0 : index
    %4 = vector.load %arg3[%c0_3, %c0_4] : memref<128x1xf32, #tpu.memory_space<vmem>>, vector<128x1xf32>
    %5 = vector.broadcast %4 : vector<128x1xf32> to vector<128x256xf32>
    %6 = arith.addf %3, %5 : vector<128x256xf32>
    %cst_5 = arith.constant 0.000000e+00 : f32
    %7 = vector.broadcast %cst_5 : f32 to vector<128x256xf32>
    %8 = arith.maximumf %6, %7 : vector<128x256xf32>
    %c0_6 = arith.constant 0 : index
    %c0_7 = arith.constant 0 : index
    %9 = vector.load %arg4[%c0_6, %c0_7] : memref<128x128xbf16, #tpu.memory_space<vmem>>, vector<128x128xbf16>
    %10 = arith.truncf %8 : vector<128x256xf32> to vector<128x256xbf16>
    %cst_8 = arith.constant dense<0.000000e+00> : vector<128x256xf32>
    %11 = tpu.matmul %9, %10, %cst_8 {dimension_numbers = #tpu.dot_dimension_numbers<[1], [0], [0], [1], [0, 0, 1, 1], [], []>} : vector<128x128xbf16>, vector<128x256xbf16>, vector<128x256xf32> -> vector<128x256xf32>
    %c0_9 = arith.constant 0 : index
    %c0_10 = arith.constant 0 : index
    %12 = vector.load %arg5[%c0_9, %c0_10] : memref<128x1xf32, #tpu.memory_space<vmem>>, vector<128x1xf32>
    %13 = vector.broadcast %12 : vector<128x1xf32> to vector<128x256xf32>
    %14 = arith.addf %11, %13 : vector<128x256xf32>
    %cst_11 = arith.constant 0.000000e+00 : f32
    %15 = vector.broadcast %cst_11 : f32 to vector<128x256xf32>
    %16 = arith.maximumf %14, %15 : vector<128x256xf32>
    %c0_12 = arith.constant 0 : index
    %c0_13 = arith.constant 0 : index
    %17 = vector.load %arg6[%c0_12, %c0_13] : memref<16x128xf32, #tpu.memory_space<vmem>>, vector<16x128xf32>
    %cst_14 = arith.constant dense<0.000000e+00> : vector<16x256xf32>
    %18 = tpu.matmul %17, %16, %cst_14 {dimension_numbers = #tpu.dot_dimension_numbers<[1], [0], [0], [1], [0, 0, 1, 1], [], []>} : vector<16x128xf32>, vector<128x256xf32>, vector<16x256xf32> -> vector<16x256xf32>
    %c0_15 = arith.constant 0 : index
    %c0_16 = arith.constant 0 : index
    %19 = vector.load %arg7[%c0_15, %c0_16] : memref<16x256xf32, #tpu.memory_space<vmem>>, vector<16x256xf32>
    tpu.vector_store %arg7[%c0_15, %c0_16], %18 {strides = array<i32>} : memref<16x256xf32, #tpu.memory_space<vmem>>, vector<16x256xf32>,
    return
  }
  func.func @transform_0(%arg0: i32) -> (i32, i32) {
    %c0_i32 = arith.constant 0 : i32
    %c0_i32_0 = arith.constant 0 : i32
    return %c0_i32, %arg0 : i32, i32
  }
  func.func @transform_1(%arg0: i32) -> (i32, i32) {
    %c0_i32 = arith.constant 0 : i32
    %c0_i32_0 = arith.constant 0 : i32
    %c0_i32_1 = arith.constant 0 : i32
    return %c0_i32, %c0_i32_0 : i32, i32
  }
  func.func @transform_2(%arg0: i32) -> (i32, i32) {
    %c0_i32 = arith.constant 0 : i32
    %c0_i32_0 = arith.constant 0 : i32
    %c0_i32_1 = arith.constant 0 : i32
    return %c0_i32, %c0_i32_0 : i32, i32
  }
  func.func @transform_3(%arg0: i32) -> (i32, i32) {
    %c0_i32 = arith.constant 0 : i32
    %c0_i32_0 = arith.constant 0 : i32
    %c0_i32_1 = arith.constant 0 : i32
    return %c0_i32, %c0_i32_0 : i32, i32
  }
  func.func @transform_4(%arg0: i32) -> (i32, i32) {
    %c0_i32 = arith.constant 0 : i32
    %c0_i32_0 = arith.constant 0 : i32
    %c0_i32_1 = arith.constant 0 : i32
    return %c0_i32, %c0_i32_0 : i32, i32
  }
  func.func @transform_5(%arg0: i32) -> (i32, i32) {
    %c0_i32 = arith.constant 0 : i32
    %c0_i32_0 = arith.constant 0 : i32
    %c0_i32_1 = arith.constant 0 : i32
    return %c0_i32, %c0_i32_0 : i32, i32
  }
  func.func @transform_6(%arg0: i32) -> (i32, i32) {
    %c0_i32 = arith.constant 0 : i32
    %c0_i32_0 = arith.constant 0 : i32
    return %c0_i32, %arg0 : i32, i32
  }
}

</mosaic_0001>

<bundles_post_ra>
// kernel: tpu_custom_call.1
= control target key start
LH: loop header
LB: loop body
LE: loop exit
PB: predicated region body
PF: predicated region fallthrough
CT: control target
= control target key end

     0   :  { %s2809_s0 = inlined_call_operand.vmem [shape: f32[32,300], index: 0, kind: input, shape index: {}]   ;;  %s2810_s1 = inlined_call_operand.vmem [shape: bf16[128,32], index: 1, kind: input, shape index: {}]   ;;  %s2811_s2 = inlined_call_operand.vmem [shape: f32[128,1], index: 2, kind: input, shape index: {}]   ;;  %s2812_s3 = inlined_call_operand.vmem [shape: bf16[128,128], index: 3, kind: input, shape index: {}]   ;;  %s2813_s4 = inlined_call_operand.vmem [shape: f32[128,1], index: 4, kind: input, shape index: {}]   ;;  %s2814_s5 = inlined_call_operand.vmem [shape: f32[16,128], index: 5, kind: input, shape index: {}]   ;;  %s2815_s6 = inlined_call_operand.hbm [shape: f32[16,300], index: 6, kind: output, shape index: {}]  }
   0x1   :  { %2817 = sst [smem:[#allocation8_spill]] %s2809_s0 }
   0x2   :  { %11 = vsyncpa [#allocation4], 0 }
   0x3   :  { %13 = vsyncpa [#allocation4 + $0x1], 0  ;;  %s2104_s21 = smov 0   ;;  %s2106_s22 = smov 0  }
   0x4   :  { %s2108_s23 = smov 0   ;;  %s2110_s24 = smov 0  }
   0x5 LB: > { %2818 = sst [smem:[#allocation6_spill]] %s1992_s23  ;;  %s2125_s25 = sadd.s32 4294967295, %s1996_s24   ;;  %s1996_s24 = sphi %s2110_s24, %s2838_s24   ;;  %s1992_s23 = sphi %s2108_s23, %s2835_s23   ;;  %s1988_s22 = sphi %s2106_s22, %s2837_s22   ;;  %s1984_s21 = sphi %s2104_s21, %s2836_s21  }
   0x6   : > { %s1605_s26 = sadd.s32 4294967294, %s1996_s24   ;;  %s2129_s27 = sadd.s32 1, %s1996_s24  }
   0x7   : > { %s26_s28 = sadd.s32 1, %s1992_s23  ;;  %s23_s29 = ssub.s32 %s1996_s24, %s2129_s27 }
   0x8   : > { %p33_p0 = scmp.ne.s32.totalorder %s1992_s23, %s1988_s22  ;;  %p24_p1 = scmp.eq.s32.totalorder %s23_s29, 0 }
   0x9   : > { %p34_p2 = scmp.eq.s32.totalorder %s1996_s24, 0  ;;  %p168_p3 = scmp.eq.s32.totalorder %s2125_s25, 1 }
   0xa   : > { %p173_p4 = scmp.ne.s32.totalorder %s1988_s22, %s1984_s21  ;;  %p174_p7 = scmp.eq.s32.totalorder %s1605_s26, 1 }
   0xb   : > { %s2141_s30 = scalar_select %p24_p1, %s1992_s23, %s26_s28  }
   0xc   : > { %p35_p5 = por %p34_p2, %p33_p0  ;;  %p2143_p6 = por %p168_p3, %p33_p0 }
   0xd   : > { %2819 = sst [smem:[#allocation7_spill]] %s2141_s30  ;;  %p2147_p8 = por %p174_p7, %p173_p4 }
   0xe   : > { %p1607_p9 = scmp.ge.s32.totalorder %s1996_s24, 2 }
  0x10   : > { %205 = sbr.rel (%p1607_p9) target bundleno = 136 (0x88), region = 36 }
  0x15   : > { %208 = sbr.rel (!%p35_p5) target bundleno = 136 (0x88), region = 40  ;;  %s210_s9 = sand.u32 (%p35_p5), 1, %s1992_s23  }
  0x16   : > { %s1609_s10 = sshll.u32 (%p35_p5), %s1996_s24, 1  ;;  %s1608_s11 = sshll.u32 (%p35_p5), %s210_s9, 6 }
  0x17   : > { %s214_s12 = ssub.s32 (%p35_p5), 3, %s1609_s10  ;;  %s1674_s13 = sshll.u32 (%p35_p5), %s1996_s24, 4 }
  0x18   : > { %p215_p10 = scmp.lt.s32.totalorder (%p35_p5), %s214_s12, 2  ;;  %s2822_s0 = sld [smem:[#allocation8_spill]] (%p35_p5) }
  0x19   : > { %s2164_s19 = scalar_lea.vmem (%p35_p5), [#allocation2], %s1608_s11  }
  0x1a   : > { %s2840_s12 = smov (!%p215_p10, %s214_s12), 2 }
  0x1b   : > { %s1610_s17 = sshll.u32 %s2840_s12, 9  ;;  %s2162_s18 = sshll.u32 %s2840_s12, 3 }
  0x1c   : > { %p1614_p11 = scmp.eq.s32.totalorder %s1610_s17, 0 }
  0x1d   : > { %p225_p12 = scmp.lt.u32.totalorder (!%p1614_p11), %s2162_s18, 8 }
  0x1e   : > { %s2160_s16 = scalar_lea.vmem %s2822_s0, %s1674_s13   ;;  %224 = sbr.rel (%p1614_p11) target bundleno = 136 (0x88), region = 44 }
  0x23   : > { %228 = sbr.rel (%p225_p12) target bundleno = 125 (0x7d), region = 48  ;;  %s2168_s20 = sand.u32 (!%p225_p12), 7, %s2162_s18  }
  0x24   : > { %p251_p13 = scmp.eq.s32.totalorder (!%p225_p12), %s2168_s20, 0  ;;  %p1615_p0 = scmp.ne.s32.totalorder (!%p225_p12), %s2168_s20, 0 }
  0x28   : > { %254 = sbr.rel (%p1615_p0) target bundleno = 79 (0x4f), region = 63  ;;  %s255_s26 = sshrl.u32 (!%p1615_p0), %s2162_s18, 3 }
  0x29   : > { %s2175_s28 = sshrl.u32 (!%p1615_p0), %s255_s26, 4 }
  0x2a   : > { %p1616_p1 = scmp.le.s32.totalorder (!%p1615_p0), %s2175_s28, 0 }
  0x2d   : > { %1533 = sbr.rel (%p1616_p1) target bundleno = 63 (0x3f), region = 162  ;;  %s2823_s29 = smov (!%p1616_p1), %s2164_s19 }
  0x2e   : > { %s2824_s9 = smov (!%p1616_p1), %s2160_s16  ;;  %s2184_s10 = smov (!%p1616_p1), 0  }
  0x2f   : > { %s2186_s11 = smov (!%p1616_p1), 0  }
  0x32 LB: >> { %v286_v0 = vld [vmem:[%s2004_s9 + $0x48] sm:$0xff]  ;;  %v288_v1 = vld [vmem:[%s2004_s9 + $0x50] sm:$0xff]  ;;  %v290_v2 = vld [vmem:[%s2004_s9 + $0x58] sm:$0xff]  ;;  %s396_s12 = sadd.s32 1, %s2008_s10  ;;  %s262_s11 = sadd.s32 1, %s2012_s11   ;;  %s2012_s11 = sphi %s2186_s11, %s262_s11   ;;  %s2008_s10 = sphi %s2184_s10, %s2825_s10   ;;  %s2004_s9 = sphi %s2824_s9, %s401_s9   ;;  %s2000_s29 = sphi %s2823_s29, %s402_s29  }
  0x33   : >> { %v292_v3 = vld [vmem:[%s2004_s9 + $0x60] sm:$0xff]  ;;  %v294_v4 = vld [vmem:[%s2004_s9 + $0x68] sm:$0xff]  ;;  %v296_v5 = vld [vmem:[%s2004_s9 + $0x70] sm:$0xff]  ;;  %365 = vst [vmem:[%s2000_s29 + $0x30] sm:$0xff] %v286_v0  ;;  %p397_p2 = scmp.ge.s32.totalorder %s396_s12, %s2175_s28  ;;  %p261_p3 = scmp.ge.s32.totalorder %s262_s11, %s2175_s28 }
  0x34   : >> { %367 = vst [vmem:[%s2000_s29 + $0x38] sm:$0xff] %v288_v1  ;;  %369 = vst [vmem:[%s2000_s29 + $0x40] sm:$0xff] %v290_v2  ;;  %v298_v6 = vld [vmem:[%s2004_s9 + $0x78] sm:$0xff]  ;;  %v326_v7 = vld [vmem:[%s2004_s9 + $0x80] sm:$0xff] }
  0x35   : >> { %v328_v8 = vld [vmem:[%s2004_s9 + $0x88] sm:$0xff]  ;;  %371 = vst [vmem:[%s2000_s29 + $0x48] sm:$0xff] %v292_v3  ;;  %373 = vst [vmem:[%s2000_s29 + $0x50] sm:$0xff] %v294_v4  ;;  %v330_v9 = vld [vmem:[%s2004_s9 + $0x90] sm:$0xff]  ;;  %s2842_s12 = smov (%p397_p2, %s396_s12), 0 }
  0x36   : >> { %375 = vst [vmem:[%s2000_s29 + $0x58] sm:$0xff] %v296_v5  ;;  %v274_v10 = vld [vmem:[%s2004_s9 + $0x18] sm:$0xff]  ;;  %v306_v11 = vld [vmem:[%s2004_s9 + $0x30] sm:$0xff]  ;;  %377 = vst [vmem:[%s2000_s29 + $0x60] sm:$0xff] %v298_v6  ;;  %s1617_s13 = sshll.u32 %s2842_s12, 7  ;;  %s2825_s10 = smov %s2842_s12 }
  0x37   : >> { %379 = vst [vmem:[%s2000_s29 + $0x68] sm:$0xff] %v326_v7  ;;  %381 = vst [vmem:[%s2000_s29 + $0x70] sm:$0xff] %v328_v8  ;;  %v358_v12 = vld [vmem:[%s2004_s9 + $0x98] sm:$0xff]  ;;  %v360_v13 = vld [vmem:[%s2004_s9 + $0xa0] sm:$0xff] }
  0x38   : >> { %v362_v14 = vld [vmem:[%s2004_s9 + $0xa8] sm:$0xff]  ;;  %301 = vst [vmem:[%s2000_s29 + $0x10] sm:$0xff] %v274_v10  ;;  %333 = vst [vmem:[%s2000_s29 + $0x20] sm:$0xff] %v306_v11  ;;  %v268_v15 = vld [vmem:[%s2004_s9] sm:$0xff] }
  0x39   : >> { %383 = vst [vmem:[%s2000_s29 + $0x78] sm:$0xff] %v330_v9  ;;  %v270_v16 = vld [vmem:[%s2004_s9 + $0x8] sm:$0xff]  ;;  %v302_v17 = vld [vmem:[%s2004_s9 + $0x20] sm:$0xff]  ;;  %385 = vst [vmem:[%s2000_s29 + $0x80] sm:$0xff] %v358_v12 }
  0x3a   : >> { %387 = vst [vmem:[%s2000_s29 + $0x88] sm:$0xff] %v360_v13  ;;  %389 = vst [vmem:[%s2000_s29 + $0x90] sm:$0xff] %v362_v14  ;;  %v334_v18 = vld [vmem:[%s2004_s9 + $0x38] sm:$0xff]  ;;  %v390_v19 = vld [vmem:[%s2004_s9 + $0xb0] sm:$0xff]  ;;  %264 = sbr.rel (!%p261_p3) target bundleno = 50 (0x32), region = 168 }
  0x3b   : >> { %269 = vst [vmem:[%s2000_s29] sm:$0xff] %v268_v15  ;;  %271 = vst [vmem:[%s2000_s29 + $0x8] sm:$0xff] %v270_v16  ;;  %v392_v20 = vld [vmem:[%s2004_s9 + $0xb8] sm:$0xff]  ;;  %v394_v21 = vld [vmem:[%s2004_s9 + $0xc0] sm:$0xff]  ;;  %s401_s9 = scalar_lea.vmem %s2160_s16, %s1617_s13  }
  0x3c   : >> { %303 = vst [vmem:[%s2000_s29 + $0x18] sm:$0xff] %v302_v17  ;;  %335 = vst [vmem:[%s2000_s29 + $0x28] sm:$0xff] %v334_v18 }
  0x3d   : >> { %391 = vst [vmem:[%s2000_s29 + $0x98] sm:$0xff] %v390_v19  ;;  %393 = vst [vmem:[%s2000_s29 + $0xa0] sm:$0xff] %v392_v20 }
  0x3e   : >> { %395 = vst [vmem:[%s2000_s29 + $0xa8] sm:$0xff] %v394_v21  ;;  %s402_s29 = scalar_lea.vmem %s2164_s19, %s1617_s13 [#allocation2]  }
  0x3f PF: > { %s2260_s14 = sand.u32 15, %s255_s26   ;;  %s1675_s15 = sshll.u32 %s2175_s28, 11 }
  0x40   : > { %s407_s17 = sshra.s32 %s1675_s15, 4  ;;  %p1622_p4 = scmp.le.s32.totalorder %s2260_s14, 0 }
  0x41   : > { %s2264_s13 = scalar_lea.vmem %s2160_s16, %s407_s17   ;;  %s2267_s0 = scalar_lea.vmem %s2164_s19, %s407_s17 [#allocation2]  }
  0x42   : > { %1547 = sbr.rel (%p1622_p4) target bundleno = 79 (0x4f), region = 173  ;;  %s2826_s29 = smov (!%p1622_p4), %s2267_s0 }
  0x43   : > { %s2827_s9 = smov (!%p1622_p4), %s2264_s13  ;;  %s2276_s10 = smov (!%p1622_p4), 0  }
  0x44   : > { %s2026_s11 = smov (!%p1622_p4), 0  }
  0x47 LB: >> { %v423_v22 = vld [vmem:[%s2020_s9] sm:$0xff]  ;;  %v425_v23 = vld [vmem:[%s2020_s9 + $0x18] sm:$0xff]  ;;  %v427_v24 = vld [vmem:[%s2020_s9 + $0x30] sm:$0xff]  ;;  %s431_s26 = sadd.s32 1, %s2024_s10  ;;  %s417_s11 = sadd.s32 1, %s2028_s11   ;;  %s2028_s11 = sphi %s2026_s11, %s417_s11   ;;  %s2024_s10 = sphi %s2276_s10, %s2828_s10   ;;  %s2020_s9 = sphi %s2827_s9, %s436_s9   ;;  %s2016_s29 = sphi %s2826_s29, %s437_s29  }
  0x48   : >> { %424 = vst [vmem:[%s2016_s29] sm:$0xff] %v423_v22  ;;  %426 = vst [vmem:[%s2016_s29 + $0x10] sm:$0xff] %v425_v23  ;;  %v429_v25 = vld [vmem:[%s2020_s9 + $0x48] sm:$0xff]  ;;  %p432_p5 = scmp.ge.s32.totalorder %s431_s26, %s2260_s14  ;;  %p416_p7 = scmp.ge.s32.totalorder %s417_s11, %s2260_s14 }
  0x49   : >> { %428 = vst [vmem:[%s2016_s29 + $0x20] sm:$0xff] %v427_v24  ;;  %430 = vst [vmem:[%s2016_s29 + $0x30] sm:$0xff] %v429_v25 }
  0x4a   : >> { %s2844_s26 = smov (%p432_p5, %s431_s26), 0  ;;  %419 = sbr.rel (!%p416_p7) target bundleno = 71 (0x47), region = 179 }
  0x4b   : >> { %s1623_s28 = sshll.u32 %s2844_s26, 3  ;;  %s2828_s10 = smov %s2844_s26 }
  0x4c   : >> { %s436_s9 = scalar_lea.vmem %s2264_s13, %s1623_s28   ;;  %s437_s29 = scalar_lea.vmem %s2267_s0, %s1623_s28 [#allocation2]  }
  0x4f PF: > { %440 = sbr.rel (%p251_p13) target bundleno = 125 (0x7d), region = 81  ;;  %s442_s12 = ssub.s32 (!%p251_p13), %s2162_s18, %s2168_s20 }
  0x50   : > { %s446_s15 = sshrl.u32 (!%p251_p13), %s2162_s18, 3  ;;  %s2297_s17 = scalar_lea.vmem (!%p251_p13), %s2160_s16, %s442_s12 }
  0x51   : > { %s2300_s10 = scalar_lea.vmem (!%p251_p13), %s2164_s19, %s442_s12 [#allocation2]  ;;  %s2304_s11 = sshrl.u32 (!%p251_p13), %s446_s15, 4 }
  0x52   : > { %p1625_p10 = scmp.le.s32.totalorder (!%p251_p13), %s2304_s11, 0 }
  0x54   : > { %1561 = sbr.rel (%p1625_p10) target bundleno = 102 (0x66), region = 184  ;;  %s2829_s0 = smov (!%p1625_p10), %s2164_s19 }
  0x55   : > { %s2830_s14 = smov (!%p1625_p10), %s2160_s16  ;;  %s2313_s13 = smov (!%p1625_p10), 0  }
  0x56   : > { %s2315_s29 = smov (!%p1625_p10), 0  }
  0x59 LB: >> { %v477_v26 = vld [vmem:[%s2036_s14 + $0x48] sm:$0xff]  ;;  %v479_v27 = vld [vmem:[%s2036_s14 + $0x50] sm:$0xff]  ;;  %v481_v28 = vld [vmem:[%s2036_s14 + $0x58] sm:$0xff]  ;;  %s587_s9 = sadd.s32 1, %s2040_s13  ;;  %s453_s29 = sadd.s32 1, %s2044_s29   ;;  %s2044_s29 = sphi %s2315_s29, %s453_s29   ;;  %s2040_s13 = sphi %s2313_s13, %s2831_s13   ;;  %s2036_s14 = sphi %s2830_s14, %s592_s14   ;;  %s2032_s0 = sphi %s2829_s0, %s593_s0  }
  0x5a   : >> { %v483_v29 = vld [vmem:[%s2036_s14 + $0x60] sm:$0xff]  ;;  %v485_v30 = vld [vmem:[%s2036_s14 + $0x68] sm:$0xff]  ;;  %v487_v31 = vld [vmem:[%s2036_s14 + $0x70] sm:$0xff]  ;;  %556 = vst [vmem:[%s2032_s0 + $0x30] sm:$0xff] %v477_v26  ;;  %p588_p11 = scmp.ge.s32.totalorder %s587_s9, %s2304_s11  ;;  %p452_p12 = scmp.ge.s32.totalorder %s453_s29, %s2304_s11 }
  0x5b   : >> { %558 = vst [vmem:[%s2032_s0 + $0x38] sm:$0xff] %v479_v27  ;;  %560 = vst [vmem:[%s2032_s0 + $0x40] sm:$0xff] %v481_v28  ;;  %v489_v32 = vld [vmem:[%s2036_s14 + $0x78] sm:$0xff]  ;;  %v517_v33 = vld [vmem:[%s2036_s14 + $0x80] sm:$0xff] }
  0x5c   : >> { %v519_v34 = vld [vmem:[%s2036_s14 + $0x88] sm:$0xff]  ;;  %562 = vst [vmem:[%s2032_s0 + $0x48] sm:$0xff] %v483_v29  ;;  %564 = vst [vmem:[%s2032_s0 + $0x50] sm:$0xff] %v485_v30  ;;  %v521_v35 = vld [vmem:[%s2036_s14 + $0x90] sm:$0xff]  ;;  %s2846_s9 = smov (%p588_p11, %s587_s9), 0 }
  0x5d   : >> { %566 = vst [vmem:[%s2032_s0 + $0x58] sm:$0xff] %v487_v31  ;;  %v465_v36 = vld [vmem:[%s2036_s14 + $0x18] sm:$0xff]  ;;  %v497_v37 = vld [vmem:[%s2036_s14 + $0x30] sm:$0xff]  ;;  %568 = vst [vmem:[%s2032_s0 + $0x60] sm:$0xff] %v489_v32  ;;  %s1626_s26 = sshll.u32 %s2846_s9, 7  ;;  %s2831_s13 = smov %s2846_s9 }
  0x5e   : >> { %570 = vst [vmem:[%s2032_s0 + $0x68] sm:$0xff] %v517_v33  ;;  %572 = vst [vmem:[%s2032_s0 + $0x70] sm:$0xff] %v519_v34  ;;  %v549_v38 = vld [vmem:[%s2036_s14 + $0x98] sm:$0xff]  ;;  %v551_v39 = vld [vmem:[%s2036_s14 + $0xa0] sm:$0xff] }
  0x5f   : >> { %v553_v40 = vld [vmem:[%s2036_s14 + $0xa8] sm:$0xff]  ;;  %492 = vst [vmem:[%s2032_s0 + $0x10] sm:$0xff] %v465_v36  ;;  %524 = vst [vmem:[%s2032_s0 + $0x20] sm:$0xff] %v497_v37  ;;  %v459_v41 = vld [vmem:[%s2036_s14] sm:$0xff] }
  0x60   : >> { %574 = vst [vmem:[%s2032_s0 + $0x78] sm:$0xff] %v521_v35  ;;  %v461_v42 = vld [vmem:[%s2036_s14 + $0x8] sm:$0xff]  ;;  %v493_v43 = vld [vmem:[%s2036_s14 + $0x20] sm:$0xff]  ;;  %576 = vst [vmem:[%s2032_s0 + $0x80] sm:$0xff] %v549_v38 }
  0x61   : >> { %578 = vst [vmem:[%s2032_s0 + $0x88] sm:$0xff] %v551_v39  ;;  %580 = vst [vmem:[%s2032_s0 + $0x90] sm:$0xff] %v553_v40  ;;  %v525_v44 = vld [vmem:[%s2036_s14 + $0x38] sm:$0xff]  ;;  %v581_v45 = vld [vmem:[%s2036_s14 + $0xb0] sm:$0xff]  ;;  %455 = sbr.rel (!%p452_p12) target bundleno = 89 (0x59), region = 190 }
  0x62   : >> { %460 = vst [vmem:[%s2032_s0] sm:$0xff] %v459_v41  ;;  %462 = vst [vmem:[%s2032_s0 + $0x8] sm:$0xff] %v461_v42  ;;  %v583_v46 = vld [vmem:[%s2036_s14 + $0xb8] sm:$0xff]  ;;  %v585_v47 = vld [vmem:[%s2036_s14 + $0xc0] sm:$0xff]  ;;  %s592_s14 = scalar_lea.vmem %s2160_s16, %s1626_s26  }
  0x63   : >> { %494 = vst [vmem:[%s2032_s0 + $0x18] sm:$0xff] %v493_v43  ;;  %526 = vst [vmem:[%s2032_s0 + $0x28] sm:$0xff] %v525_v44 }
  0x64   : >> { %582 = vst [vmem:[%s2032_s0 + $0x98] sm:$0xff] %v581_v45  ;;  %584 = vst [vmem:[%s2032_s0 + $0xa0] sm:$0xff] %v583_v46 }
  0x65   : >> { %586 = vst [vmem:[%s2032_s0 + $0xa8] sm:$0xff] %v585_v47  ;;  %s593_s0 = scalar_lea.vmem %s2164_s19, %s1626_s26 [#allocation2]  }
  0x66 PF: > { %s2389_s28 = sand.u32 15, %s446_s15   ;;  %s1677_s12 = sshll.u32 %s2304_s11, 11 }
  0x67   : > { %s598_s26 = sshra.s32 %s1677_s12, 4  ;;  %p1631_p13 = scmp.le.s32.totalorder %s2389_s28, 0 }
  0x68   : > { %s2393_s30 = scalar_lea.vmem %s2160_s16, %s598_s26   ;;  %s2396_s23 = scalar_lea.vmem %s2164_s19, %s598_s26 [#allocation2]  }
  0x69   : > { %1575 = sbr.rel (%p1631_p13) target bundleno = 118 (0x76), region = 195  ;;  %s2832_s0 = smov (!%p1631_p13), %s2396_s23 }
  0x6a   : > { %s2833_s14 = smov (!%p1631_p13), %s2393_s30  ;;  %s2054_s13 = smov (!%p1631_p13), 0  }
  0x6b   : > { %s2058_s29 = smov (!%p1631_p13), 0  }
  0x6e LB: >> { %v614_v48 = vld [vmem:[%s2052_s14] sm:$0xff]  ;;  %v616_v49 = vld [vmem:[%s2052_s14 + $0x18] sm:$0xff]  ;;  %v618_v50 = vld [vmem:[%s2052_s14 + $0x30] sm:$0xff]  ;;  %s622_s15 = sadd.s32 1, %s2056_s13  ;;  %s608_s29 = sadd.s32 1, %s2060_s29   ;;  %s2060_s29 = sphi %s2058_s29, %s608_s29   ;;  %s2056_s13 = sphi %s2054_s13, %s2055_s13   ;;  %s2052_s14 = sphi %s2833_s14, %s627_s14   ;;  %s2048_s0 = sphi %s2832_s0, %s628_s0  }
  0x6f   : >> { %615 = vst [vmem:[%s2048_s0] sm:$0xff] %v614_v48  ;;  %617 = vst [vmem:[%s2048_s0 + $0x10] sm:$0xff] %v616_v49  ;;  %v620_v51 = vld [vmem:[%s2052_s14 + $0x48] sm:$0xff]  ;;  %p623_p0 = scmp.ge.s32.totalorder %s622_s15, %s2389_s28  ;;  %p607_p1 = scmp.ge.s32.totalorder %s608_s29, %s2389_s28 }
  0x70   : >> { %619 = vst [vmem:[%s2048_s0 + $0x20] sm:$0xff] %v618_v50  ;;  %621 = vst [vmem:[%s2048_s0 + $0x30] sm:$0xff] %v620_v51 }
  0x71   : >> { %s2848_s15 = smov (%p623_p0, %s622_s15), 0  ;;  %610 = sbr.rel (!%p607_p1) target bundleno = 110 (0x6e), region = 201 }
  0x72   : >> { %s1632_s11 = sshll.u32 %s2848_s15, 3  ;;  %s2055_s13 = smov %s2848_s15  }
  0x73   : >> { %s627_s14 = scalar_lea.vmem %s2393_s30, %s1632_s11   ;;  %s628_s0 = scalar_lea.vmem %s2396_s23, %s1632_s11 [#allocation2]  }
  0x76 PF: > { %s2062_s9 = smov 1  }
  0x77   : > { %s629_s12 = sshll.u32 %s2062_s9, %s2168_s20 }
  0x78   : > { %s1634_s26 = sadd.s32 4294967295, %s629_s12 }
  0x79   : > { %v639_v52 = vld [vmem:[%s2297_s17] sm:%s1634_s26]  ;;  %v641_v53 = vld [vmem:[%s2297_s17 + $0x18] sm:%s1634_s26] }
  0x7a   : > { %640 = vst [vmem:[%s2300_s10] sm:%s1634_s26] %v639_v52  ;;  %642 = vst [vmem:[%s2300_s10 + $0x10] sm:%s1634_s26] %v641_v53 }
  0x7b   : > { %v643_v54 = vld [vmem:[%s2297_s17 + $0x30] sm:%s1634_s26]  ;;  %v645_v55 = vld [vmem:[%s2297_s17 + $0x48] sm:%s1634_s26] }
  0x7c   : > { %644 = vst [vmem:[%s2300_s10 + $0x20] sm:%s1634_s26] %v643_v54  ;;  %646 = vst [vmem:[%s2300_s10 + $0x30] sm:%s1634_s26] %v645_v55 }
  0x7d PF: > { %p1635_p2 = scmp.ge.u32.totalorder %s2162_s18, 8 }
  0x7e   : > { %s2063_s23 = smov (!%p1635_p2), 1  }
  0x7f   : > { %231 = sbr.rel (%p1635_p2) target bundleno = 136 (0x88), region = 52  ;;  %s232_s30 = sshll.u32 (!%p1635_p2), %s2063_s23, %s2162_s18 }
  0x80   : > { %s1636_s20 = sadd.s32 (!%p1635_p2), 4294967295, %s232_s30 }
  0x84   : > { %v242_v56 = vld [vmem:[%s2160_s16] sm:%s1636_s20]  ;;  %v244_v57 = vld [vmem:[%s2160_s16 + $0x18] sm:%s1636_s20] }
  0x85   : > { %243 = vst [vmem:[%s2164_s19] sm:%s1636_s20] %v242_v56  ;;  %245 = vst [vmem:[%s2164_s19 + $0x10] sm:%s1636_s20] %v244_v57 }
  0x86   : > { %v246_v58 = vld [vmem:[%s2160_s16 + $0x30] sm:%s1636_s20]  ;;  %v248_v59 = vld [vmem:[%s2160_s16 + $0x48] sm:%s1636_s20] }
  0x87   : > { %247 = vst [vmem:[%s2164_s19 + $0x20] sm:%s1636_s20] %v246_v58  ;;  %249 = vst [vmem:[%s2164_s19 + $0x30] sm:%s1636_s20] %v248_v59 }
  0x88 PF: > { %p1637_p3 = scmp.ge.s32.totalorder %s1996_s24, 1  ;;  %p649_p4 = scmp.lt.s32.totalorder %s1996_s24, 3 }
  0x8a   : > { %p650_p5 = pnand %p1637_p3, %p649_p4 }
  0x8b   : > { %s2437_s18 = sand.u32 (!%p650_p5), 1, %s1988_s22  }
  0x8c   : > { %653 = sbr.rel (%p650_p5) target bundleno = 968 (0x3c8), region = 106  ;;  %s1638_s17 = sshll.u32 (!%p650_p5), %s2437_s18, 6 }
  0x8d   : > { %s658_s16 = scalar_lea.vmem (!%p650_p5), [#allocation2], %s1638_s17  ;;  %s1639_s17 = sshll.u32 (!%p650_p5), %s2437_s18, 5 }
  0x8e   : > { %s1435_s19 = scalar_lea.sflag (!%p650_p5), [#allocation4], %s2437_s18 }
  0x91   : > { %v2064_v60 = vmov 0   ;;  %v701_v61 = vld [vmem:[%s658_s16 + $0x28] sm:$0xff]  ;;  %v703_v62 = vld [vmem:[%s658_s16 + $0x38] sm:$0xff]  ;;  %v700_v63 = vld [vmem:[%s658_s16 + $0x20] sm:$0xff]  ;;  %vm860_vm0 = vcmask 261120   ;;  %s1665_s10 = sshll.u32 (%p2143_p6), %s2125_s25, 1 }
  0x92   : > { %917 = vmatprep.mubr.bf16.mxu0 %v2064_v60  ;;  %1854 = vset.pattern.permute.xlu0 %v2064_v60  ;;  %v707_v0 = vpack.c.bf16 %v703_v62, %v701_v61  ;;  %v702_v1 = vld [vmem:[%s658_s16 + $0x30] sm:$0xff]  ;;  %v697_v2 = vld [vmem:[%s658_s16 + $0x8] sm:$0xff]  ;;  %v699_v3 = vld [vmem:[%s658_s16 + $0x18] sm:$0xff]  ;;  %s1443_s28 = ssub.s32 (%p2143_p6), 3, %s1665_s10 }
  0x93   : > { %1855 = vset.pattern.permute.xlu1 %v2064_v60  ;;  %1238 = vmatprep.mubr.bf16.mxu1 %v2064_v60  ;;  %v706_v4 = vpack.c.bf16 %v702_v1, %v700_v63  ;;  %v705_v5 = vpack.c.bf16 %v699_v3, %v697_v2  ;;  %v696_v6 = vld [vmem:[%s658_s16] sm:$0xff]  ;;  %v698_v7 = vld [vmem:[%s658_s16 + $0x10] sm:$0xff]  ;;  %v739_v12 = vld [vmem:[%s2811_s2 + $0x78] sm:$0xff]  ;;  %s684_s16 = scalar_lea.vmem [#allocation3], %s1639_s17  ;;  %p1444_p7 = scmp.lt.s32.totalorder (%p2143_p6), %s1443_s28, 2 }
  0x94   : > { %897 = vmatprep.subr.bf16.mxu0 %v707_v0  ;;  %v704_v8 = vpack.c.bf16 %v698_v7, %v696_v6  ;;  %v1856_v9 = vld [vmem:[%s2810_s1] sm:$0xff]   ;;  %v738_v10 = vld [vmem:[%s2811_s2 + $0x70] sm:$0xff]  ;;  %v737_v13 = vld [vmem:[%s2811_s2 + $0x68] sm:$0xff] }
  0x95   : > { %898 = vmatpush1.bf16.msra.mxu0 %v706_v4  ;;  %812 = vperm.xlu0 %1854, %v738_v10   ;;  %v736_v11 = vld [vmem:[%s2811_s2 + $0x60] sm:$0xff]  ;;  %v734_v14 = vld [vmem:[%s2811_s2 + $0x50] sm:$0xff]  ;;  %v735_v15 = vld [vmem:[%s2811_s2 + $0x58] sm:$0xff] }
  0x96   : > { %899 = vmatprep.subr.bf16.mxu0 %v705_v5  ;;  %802 = vperm.xlu1 %1855, %v736_v11   ;;  %v1857_v16 = vld [vmem:[%s2810_s1 + $0x8] sm:$0xff]   ;;  %v732_v17 = vld [vmem:[%s2811_s2 + $0x40] sm:$0xff]  ;;  %v730_v19 = vld [vmem:[%s2811_s2 + $0x30] sm:$0xff] }
  0x97   : > { %v733_v18 = vld [vmem:[%s2811_s2 + $0x48] sm:$0xff]  ;;  %v731_v20 = vld [vmem:[%s2811_s2 + $0x38] sm:$0xff]  ;;  %v1858_v21 = vld [vmem:[%s2810_s1 + $0x10] sm:$0xff]  }
  0x98   : > { %v728_v22 = vld [vmem:[%s2811_s2 + $0x20] sm:$0xff]  ;;  %v729_v23 = vld [vmem:[%s2811_s2 + $0x28] sm:$0xff]  ;;  %v726_v24 = vld [vmem:[%s2811_s2 + $0x10] sm:$0xff] }
  0x99   : > { %900 = vmatpush1.bf16.msra.mxu0 %v704_v8  ;;  %817 = vperm.xlu0 %1854, %v739_v12   ;;  %v727_v25 = vld [vmem:[%s2811_s2 + $0x18] sm:$0xff]  ;;  %v724_v27 = vld [vmem:[%s2811_s2] sm:$0xff]  ;;  %v725_v28 = vld [vmem:[%s2811_s2 + $0x8] sm:$0xff] }
  0x9a   : > { %807 = vperm.xlu1 %1855, %v737_v13   ;;  %v1859_v26 = vld [vmem:[%s2810_s1 + $0x18] sm:$0xff]   ;;  %v1076_v30 = vld [vmem:[%s2813_s4 + $0x70] sm:$0xff]  ;;  %v1860_v31 = vld [vmem:[%s2810_s1 + $0x20] sm:$0xff]  }
  0x9b   : > { %v1077_v29 = vld [vmem:[%s2813_s4 + $0x78] sm:$0xff]  ;;  %v1075_v32 = vld [vmem:[%s2813_s4 + $0x68] sm:$0xff]  ;;  %v1074_v33 = vld [vmem:[%s2813_s4 + $0x60] sm:$0xff] }
  0x9c   : > { %1648 = vmatmul.mubr.msk.bf16.vlgmr.msra.gmra.mxu0 %vm860_vm0, %v1856_v9  ;;  %v1073_v34 = vld [vmem:[%s2813_s4 + $0x58] sm:$0xff]  ;;  %v1072_v35 = vld [vmem:[%s2813_s4 + $0x50] sm:$0xff]  ;;  %v1861_v36 = vld [vmem:[%s2810_s1 + $0x28] sm:$0xff]  }
  0x9d   : > { %927 = vmatprep.mubr.bf16.mxu0 %v2064_v60  ;;  %792 = vperm.xlu0 %1854, %v734_v14   ;;  %v1071_v37 = vld [vmem:[%s2813_s4 + $0x48] sm:$0xff]  ;;  %v1070_v38 = vld [vmem:[%s2813_s4 + $0x40] sm:$0xff]  ;;  %v1069_v39 = vld [vmem:[%s2813_s4 + $0x38] sm:$0xff] }
  0x9e   : > { %797 = vperm.xlu1 %1855, %v735_v15   ;;  %v1068_v40 = vld [vmem:[%s2813_s4 + $0x30] sm:$0xff]  ;;  %v1067_v42 = vld [vmem:[%s2813_s4 + $0x28] sm:$0xff]  ;;  %v1066_v43 = vld [vmem:[%s2813_s4 + $0x20] sm:$0xff] }
  0x9f   : > { %v1862_v41 = vld [vmem:[%s2810_s1 + $0x30] sm:$0xff]   ;;  %v1065_v44 = vld [vmem:[%s2813_s4 + $0x18] sm:$0xff]  ;;  %v1063_v47 = vld [vmem:[%s2813_s4 + $0x8] sm:$0xff] }
  0xa0   : > { %v1064_v45 = vld [vmem:[%s2813_s4 + $0x10] sm:$0xff]  ;;  %v1863_v46 = vld [vmem:[%s2810_s1 + $0x38] sm:$0xff]   ;;  %v1062_v48 = vld [vmem:[%s2813_s4] sm:$0xff] }
  0xa1   : > { %782 = vperm.xlu0 %1854, %v732_v17  }
  0xa2   : > { %787 = vperm.xlu1 %1855, %v733_v18  }
  0xa4   : > { %1649 = vmatmul.mubr.msk.bf16.gmra.mxu0 %vm860_vm0, %v1857_v16 }
  0xa5   : > { %937 = vmatprep.mubr.bf16.mxu0 %v2064_v60  ;;  %772 = vperm.xlu0 %1854, %v730_v19  }
  0xa6   : > { %777 = vperm.xlu1 %1855, %v731_v20  }
  0xa9   : > { %762 = vperm.xlu0 %1854, %v728_v22  }
  0xaa   : > { %767 = vperm.xlu1 %1855, %v729_v23  }
  0xac   : > { %1650 = vmatmul.mubr.msk.bf16.gmra.mxu0 %vm860_vm0, %v1858_v21 }
  0xad   : > { %947 = vmatprep.mubr.bf16.mxu0 %v2064_v60  ;;  %752 = vperm.xlu0 %1854, %v726_v24  }
  0xae   : > { %757 = vperm.xlu1 %1855, %v727_v25  }
  0xb1   : > { %742 = vperm.xlu0 %1854, %v724_v27  }
  0xb2   : > { %747 = vperm.xlu1 %1855, %v725_v28  }
  0xb4   : > { %1651 = vmatmul.mubr.msk.bf16.gmra.mxu0 %vm860_vm0, %v1859_v26 }
  0xb5   : > { %957 = vmatprep.mubr.bf16.mxu0 %v2064_v60  ;;  %1155 = vperm.xlu0 %1854, %v1077_v29  }
  0xb6   : > { %1150 = vperm.xlu1 %1855, %v1076_v30  }
  0xb9   : > { %1145 = vperm.xlu0 %1854, %v1075_v32  }
  0xba   : > { %1140 = vperm.xlu1 %1855, %v1074_v33  }
  0xbc   : > { %1652 = vmatmul.mubr.msk.bf16.gmra.mxu0 %vm860_vm0, %v1860_v31 }
  0xbd   : > { %967 = vmatprep.mubr.bf16.mxu0 %v2064_v60  ;;  %1135 = vperm.xlu0 %1854, %v1073_v34  }
  0xbe   : > { %1130 = vperm.xlu1 %1855, %v1072_v35  }
  0xc1   : > { %1125 = vperm.xlu0 %1854, %v1071_v37  }
  0xc2   : > { %1120 = vperm.xlu1 %1855, %v1070_v38  }
  0xc4   : > { %1653 = vmatmul.mubr.msk.bf16.gmra.mxu0 %vm860_vm0, %v1861_v36 }
  0xc5   : > { %977 = vmatprep.mubr.bf16.mxu0 %v2064_v60  ;;  %1115 = vperm.xlu0 %1854, %v1069_v39  }
  0xc6   : > { %1110 = vperm.xlu1 %1855, %v1068_v40  }
  0xc9   : > { %1105 = vperm.xlu0 %1854, %v1067_v42  }
  0xca   : > { %1100 = vperm.xlu1 %1855, %v1066_v43  }
  0xcc   : > { %1654 = vmatmul.mubr.msk.bf16.gmra.mxu0 %vm860_vm0, %v1862_v41 }
  0xcd   : > { %987 = vmatprep.mubr.bf16.mxu0 %v2064_v60  ;;  %1095 = vperm.xlu0 %1854, %v1065_v44  }
  0xce   : > { %1090 = vperm.xlu1 %1855, %v1064_v45  }
  0xd1   : > { %1085 = vperm.xlu0 %1854, %v1063_v47  }
  0xd2   : > { %1080 = vperm.xlu1 %1855, %v1062_v48  }
  0xd4   : > { %1655 = vmatmul.mubr.msk.bf16.gmra.mxu0 %vm860_vm0, %v1863_v46 }
 0x110   : > { %v2579_v49 = vpop.permute.xlu0 %812 }
 0x111   : > { %v2581_v50 = vpop.permute.xlu1 %802 }
 0x114   : > { %v2583_v51 = vpop.permute.xlu0 %817 }
 0x115   : > { %v2585_v52 = vpop.permute.xlu1 %807 }
 0x118   : > { %v2587_v53 = vpop.permute.xlu0 %792 }
 0x119   : > { %v2589_v54 = vpop.permute.xlu1 %797 }
 0x11c   : > { %v2591_v55 = vpop.permute.xlu0 %782 }
 0x11d   : > { %v2593_v56 = vpop.permute.xlu1 %787 }
 0x120   : > { %v2595_v57 = vpop.permute.xlu0 %772 }
 0x121   : > { %v2597_v58 = vpop.permute.xlu1 %777 }
 0x124   : > { %v2599_v59 = vpop.permute.xlu0 %762 }
 0x125   : > { %v2601_v61 = vpop.permute.xlu1 %767 }
 0x128   : > { %v753_v62 = vpop.permute.xlu0 %752 }
 0x129   : > { %v758_v63 = vpop.permute.xlu1 %757 }
 0x12c   : > { %v743_v0 = vpop.permute.xlu0 %742 }
 0x12d   : > { %v748_v3 = vpop.permute.xlu1 %747 }
 0x15c   : > { %v919_v1 = vpop.f32.mrf.mxu0 }
 0x15d   : > { %v920_v4 = vadd.f32 %v919_v1, %v743_v0 }
 0x15e   : > { %v921_v2 = vpop.f32.mrf.mxu0 }
 0x15f   : > { %v922_v6 = vadd.f32 %v921_v2, %v743_v0  ;;  %v998_v9 = vmax.f32 %v920_v4, 0.0 }
 0x160   : > { %v923_v5 = vpop.f32.mrf.mxu0 }
 0x161   : > { %v924_v7 = vadd.f32 %v923_v5, %v748_v3  ;;  %v999_v13 = vmax.f32 %v922_v6, 0.0 }
 0x162   : > { %v925_v8 = vpop.f32.mrf.mxu0 }
 0x163   : > { %v1000_v10 = vmax.f32 %v924_v7, 0.0  ;;  %v926_v11 = vadd.f32 %v925_v8, %v748_v3 }
 0x164   : > { %v929_v12 = vpop.f32.mrf.mxu0 }
 0x165   : > { %v2603_v14 = vpack.c.bf16 %v1000_v10, %v998_v9  ;;  %v1001_v15 = vmax.f32 %v926_v11, 0.0  ;;  %v930_v18 = vadd.f32 %v929_v12, %v753_v62 }
 0x166   : > { %v931_v16 = vpop.f32.mrf.mxu0 }
 0x167   : > { %v2605_v17 = vpack.c.bf16 %v1001_v15, %v999_v13  ;;  %v932_v20 = vadd.f32 %v931_v16, %v753_v62  ;;  %v1002_v23 = vmax.f32 %v930_v18, 0.0 }
 0x168   : > { %v933_v19 = vpop.f32.mrf.mxu0 }
 0x169   : > { %v934_v21 = vadd.f32 %v933_v19, %v758_v63  ;;  %v1003_v27 = vmax.f32 %v932_v20, 0.0 }
 0x16a   : > { %v935_v22 = vpop.f32.mrf.mxu0 }
 0x16b   : > { %v1004_v24 = vmax.f32 %v934_v21, 0.0  ;;  %v936_v25 = vadd.f32 %v935_v22, %v758_v63 }
 0x16c   : > { %v2607_v26 = vpop.f32.mrf.mxu0 }
 0x16d   : > { %v2609_v28 = vpack.c.bf16 %v1004_v24, %v1002_v23  ;;  %v1005_v29 = vmax.f32 %v936_v25, 0.0 }
 0x16e   : > { %v2611_v30 = vpop.f32.mrf.mxu0 }
 0x16f   : > { %v2613_v31 = vpack.c.bf16 %v1005_v29, %v1003_v27 }
 0x170   : > { %v2615_v32 = vpop.f32.mrf.mxu0 }
 0x172   : > { %v2617_v33 = vpop.f32.mrf.mxu0 }
 0x174   : > { %v2619_v34 = vpop.f32.mrf.mxu0 }
 0x176   : > { %v951_v35 = vpop.f32.mrf.mxu0 }
 0x178   : > { %v953_v36 = vpop.f32.mrf.mxu0 }
 0x17a   : > { %v955_v37 = vpop.f32.mrf.mxu0 }
 0x17c   : > { %v959_v38 = vpop.f32.mrf.mxu0 }
 0x17e   : > { %v961_v39 = vpop.f32.mrf.mxu0 }
 0x180   : > { %v963_v40 = vpop.f32.mrf.mxu0 }
 0x182   : > { %v965_v41 = vpop.f32.mrf.mxu0 }
 0x184   : > { %v969_v42 = vpop.f32.mrf.mxu0 }
 0x185   : > { %v970_v25 = vadd.f32 %v969_v42, %v2587_v53 }
 0x186   : > { %v971_v43 = vpop.f32.mrf.mxu0 }
 0x187   : > { %v972_v19 = vadd.f32 %v971_v43, %v2587_v53  ;;  %v964_v43 = vadd.f32 %v963_v40, %v2593_v56  ;;  %v952_v53 = vadd.f32 %v951_v35, %v2595_v57 }
 0x188   : > { %v973_v44 = vpop.f32.mrf.mxu0 }
 0x189   : > { %v974_v21 = vadd.f32 %v973_v44, %v2589_v54  ;;  %v1019_v29 = vmax.f32 %v972_v19, 0.0  ;;  %v1011_v35 = vmax.f32 %v952_v53, 0.0 }
 0x18a   : > { %v975_v45 = vpop.f32.mrf.mxu0 }
 0x18b   : > { %v976_v11 = vadd.f32 %v975_v45, %v2589_v54  ;;  %v1020_v45 = vmax.f32 %v974_v21, 0.0  ;;  %v956_v54 = vadd.f32 %v955_v37, %v2597_v58  ;;  %v950_v37 = vadd.f32 %v2619_v34, %v2595_v57 }
 0x18c   : > { %v979_v46 = vpop.f32.mrf.mxu0 }
 0x18d   : > { %v980_v16 = vadd.f32 %v979_v46, %v2581_v50  ;;  %v1013_v40 = vmax.f32 %v956_v54, 0.0  ;;  %v1151_v54 = vpop.permute.xlu1 %1150 }
 0x18e   : > { %v981_v47 = vpop.f32.mrf.mxu0 }
 0x18f   : > { %v982_v7 = vadd.f32 %v981_v47, %v2581_v50  ;;  %v1022_v27 = vmax.f32 %v980_v16, 0.0  ;;  %v962_v50 = vadd.f32 %v961_v39, %v2591_v55  ;;  %v954_v39 = vadd.f32 %v953_v36, %v2597_v58 }
 0x190   : > { %v983_v48 = vpop.f32.mrf.mxu0  ;;  %v944_v58 = vadd.f32 %v2615_v32, %v2601_v61  ;;  %v1871_v32 = vld [vmem:[%s2812_s3 + $0x38] sm:$0xff]  }
 0x191   : > { %v984_v9 = vadd.f32 %v983_v48, %v2585_v52  ;;  %v1023_v20 = vmax.f32 %v982_v7, 0.0  ;;  %v1018_v48 = vmax.f32 %v970_v25, 0.0  ;;  %v1015_v42 = vmax.f32 %v962_v50, 0.0  ;;  %v1141_v53 = vpop.permute.xlu1 %1140 }
 0x192   : > { %v985_v62 = vpop.f32.mrf.mxu0  ;;  %v1012_v36 = vmax.f32 %v954_v39, 0.0  ;;  %v1008_v34 = vmax.f32 %v944_v58, 0.0 }
 0x193   : > { %v986_v2 = vadd.f32 %v985_v62, %v2585_v52  ;;  %v1024_v22 = vmax.f32 %v984_v9, 0.0  ;;  %v1021_v52 = vmax.f32 %v976_v11, 0.0  ;;  %v1016_v62 = vmax.f32 %v964_v43, 0.0 }
 0x194   : > { %v989_v63 = vpop.f32.mrf.mxu0 }
 0x195   : > { %v990_v5 = vadd.f32 %v989_v63, %v2579_v49  ;;  %v1025_v12 = vmax.f32 %v986_v2, 0.0  ;;  %v1058_v46 = vpack.c.bf16 %v1024_v22, %v1022_v27  ;;  %v1057_v47 = vpack.c.bf16 %v1021_v52, %v1019_v29 }
 0x196   : > { %v991_v0 = vpop.f32.mrf.mxu0  ;;  %v1056_v63 = vpack.c.bf16 %v1020_v45, %v1018_v48  ;;  %v1156_v45 = vpop.permute.xlu0 %1155 }
 0x197   : > { %v992_v3 = vadd.f32 %v991_v0, %v2579_v49  ;;  %v1026_v18 = vmax.f32 %v990_v5, 0.0  ;;  %v1059_v24 = vpack.c.bf16 %v1025_v12, %v1023_v20 }
 0x198   : > { %v993_v1 = vpop.f32.mrf.mxu0 }
 0x199   : > { %v994_v4 = vadd.f32 %v993_v1, %v2583_v51  ;;  %v1027_v13 = vmax.f32 %v992_v3, 0.0  ;;  %v1053_v3 = vpack.c.bf16 %v1013_v40, %v1011_v35 }
 0x19a   : > { %v995_v6 = vpop.f32.mrf.mxu0 }
 0x19b   : > { %v996_v8 = vadd.f32 %v995_v6, %v2583_v51  ;;  %v1028_v10 = vmax.f32 %v994_v4, 0.0  ;;  %v966_v51 = vadd.f32 %v965_v41, %v2593_v56  ;;  %v960_v41 = vadd.f32 %v959_v38, %v2591_v55 }
 0x19c   : > { %v946_v56 = vadd.f32 %v2617_v33, %v2601_v61  ;;  %v942_v55 = vadd.f32 %v2611_v30, %v2599_v59  ;;  %v940_v33 = vadd.f32 %v2607_v26, %v2599_v59  ;;  %v1010_v4 = vmax.f32 %v950_v37, 0.0  ;;  %v1864_v59 = vld [vmem:[%s2812_s3] sm:$0xff]   ;;  %v1865_v61 = vld [vmem:[%s2812_s3 + $0x8] sm:$0xff]  }
 0x19d   : > { %v1029_v15 = vmax.f32 %v996_v8, 0.0  ;;  %v1060_v23 = vpack.c.bf16 %v1028_v10, %v1026_v18  ;;  %v1017_v44 = vmax.f32 %v966_v51, 0.0  ;;  %v1014_v1 = vmax.f32 %v960_v41, 0.0  ;;  %v1868_v26 = vld [vmem:[%s2812_s3 + $0x20] sm:$0xff]   ;;  %v1146_v41 = vpop.permute.xlu0 %1145 }
 0x19e   : > { %v1009_v2 = vmax.f32 %v946_v56, 0.0  ;;  %v1007_v57 = vmax.f32 %v942_v55, 0.0  ;;  %v1052_v5 = vpack.c.bf16 %v1012_v36, %v1010_v4  ;;  %v1006_v30 = vmax.f32 %v940_v33, 0.0  ;;  %v1131_v56 = vpop.permute.xlu1 %1130 }
 0x19f   : > { %v1061_v49 = vpack.c.bf16 %v1029_v15, %v1027_v13  ;;  %v1055_v0 = vpack.c.bf16 %v1017_v44, %v1015_v42  ;;  %v1054_v38 = vpack.c.bf16 %v1016_v62, %v1014_v1  ;;  %v2065_v8 = vmov 0.0  }
 0x1a0   : > { %v1051_v6 = vpack.c.bf16 %v1009_v2, %v1007_v57  ;;  %v1050_v7 = vpack.c.bf16 %v1008_v34, %v1006_v30  ;;  %1417 = vmatprep.mubr.f32.mxu0 %v2065_v8 }
 0x1a1   : > { %1206 = vmatprep.subr.bf16.mxu1 %v1061_v49  ;;  %v1136_v62 = vpop.permute.xlu0 %1135 }
 0x1a2   : > { %1207 = vmatpush1.bf16.msra.mxu1 %v1060_v23  ;;  %v1121_v2 = vpop.permute.xlu1 %1120 }
 0x1a3   : > { %1208 = vmatprep.subr.bf16.mxu1 %v1059_v24 }
 0x1a5   : > { %v1126_v35 = vpop.permute.xlu0 %1125 }
 0x1a6   : > { %1209 = vmatpush1.bf16.msra.mxu1 %v1058_v46 }
 0x1a7   : > { %1210 = vmatprep.subr.bf16.mxu1 %v1057_v47 }
 0x1aa   : > { %1211 = vmatpush1.bf16.msra.mxu1 %v1056_v63 }
 0x1ab   : > { %1212 = vmatprep.subr.bf16.mxu1 %v1055_v0 }
 0x1ae   : > { %1213 = vmatpush1.bf16.msra.mxu1 %v1054_v38 }
 0x1af   : > { %1214 = vmatprep.subr.bf16.mxu1 %v1053_v3 }
 0x1b2   : > { %1215 = vmatpush1.bf16.msra.mxu1 %v1052_v5 }
 0x1b3   : > { %1216 = vmatprep.subr.bf16.mxu1 %v1051_v6 }
 0x1b6   : > { %1217 = vmatpush1.bf16.msra.mxu1 %v1050_v7  ;;  %v1116_v7 = vpop.permute.xlu0 %1115 }
 0x1b7   : > { %1218 = vmatprep.subr.bf16.mxu1 %v2613_v31  ;;  %v1870_v31 = vld [vmem:[%s2812_s3 + $0x30] sm:$0xff]  }
 0x1ba   : > { %1219 = vmatpush1.bf16.msra.mxu1 %v2609_v28  ;;  %v1869_v28 = vld [vmem:[%s2812_s3 + $0x28] sm:$0xff]  }
 0x1bb   : > { %1220 = vmatprep.subr.bf16.mxu1 %v2605_v17  ;;  %v1866_v17 = vld [vmem:[%s2812_s3 + $0x10] sm:$0xff]  }
 0x1be   : > { %1221 = vmatpush1.bf16.msra.mxu1 %v2603_v14  ;;  %v1867_v14 = vld [vmem:[%s2812_s3 + $0x18] sm:$0xff]  }
 0x1c1   : > { %1239 = vmatmul.mubr.bf16.vlgmr.msra.gmra.mxu1 %v1864_v59 }
 0x1c2   : > { %1248 = vmatprep.mubr.bf16.mxu1 %v2064_v60 }
 0x1c9   : > { %1249 = vmatmul.mubr.bf16.gmra.mxu1 %v1865_v61 }
 0x1ca   : > { %1258 = vmatprep.mubr.bf16.mxu1 %v2064_v60 }
 0x1d1   : > { %1259 = vmatmul.mubr.bf16.gmra.mxu1 %v1866_v17 }
 0x1d2   : > { %1268 = vmatprep.mubr.bf16.mxu1 %v2064_v60 }
 0x1d9   : > { %1269 = vmatmul.mubr.bf16.gmra.mxu1 %v1867_v14 }
 0x1da   : > { %1278 = vmatprep.mubr.bf16.mxu1 %v2064_v60 }
 0x1e1   : > { %1279 = vmatmul.mubr.bf16.gmra.mxu1 %v1868_v26  ;;  %v1111_v26 = vpop.permute.xlu1 %1110 }
 0x1e2   : > { %1288 = vmatprep.mubr.bf16.mxu1 %v2064_v60 }
 0x1e9   : > { %1289 = vmatmul.mubr.bf16.gmra.mxu1 %v1869_v28 }
 0x1ea   : > { %1298 = vmatprep.mubr.bf16.mxu1 %v2064_v60 }
 0x1f1   : > { %1299 = vmatmul.mubr.bf16.gmra.mxu1 %v1870_v31 }
 0x1f2   : > { %1308 = vmatprep.mubr.bf16.mxu1 %v2064_v60 }
 0x1f9   : > { %1309 = vmatmul.mubr.bf16.gmra.mxu1 %v1871_v32 }
 0x281   : > { %v2686_v9 = vpop.f32.mrf.mxu1 }
 0x283   : > { %v2688_v10 = vpop.f32.mrf.mxu1 }
 0x285   : > { %v2690_v11 = vpop.f32.mrf.mxu1 }
 0x287   : > { %v2692_v12 = vpop.f32.mrf.mxu1 }
 0x289   : > { %v2694_v13 = vpop.f32.mrf.mxu1 }
 0x28b   : > { %v2696_v15 = vpop.f32.mrf.mxu1 }
 0x28d   : > { %v2698_v60 = vpop.f32.mrf.mxu1 }
 0x28f   : > { %v2700_v16 = vpop.f32.mrf.mxu1 }
 0x291   : > { %v2702_v18 = vpop.f32.mrf.mxu1 }
 0x293   : > { %v2704_v19 = vpop.f32.mrf.mxu1 }
 0x295   : > { %v2706_v20 = vpop.f32.mrf.mxu1 }
 0x297   : > { %v2708_v49 = vpop.f32.mrf.mxu1 }
 0x299   : > { %v2710_v21 = vpop.f32.mrf.mxu1 }
 0x29b   : > { %v2712_v22 = vpop.f32.mrf.mxu1 }
 0x29d   : > { %v2714_v23 = vpop.f32.mrf.mxu1 }
 0x29f   : > { %v2716_v51 = vpop.f32.mrf.mxu1 }
 0x2a1   : > { %v1280_v52 = vpop.f32.mrf.mxu1 }
 0x2a3   : > { %v1282_v24 = vpop.f32.mrf.mxu1 }
 0x2a5   : > { %v1284_v25 = vpop.f32.mrf.mxu1 }
 0x2a7   : > { %v1286_v27 = vpop.f32.mrf.mxu1 }
 0x2a8   : > { %v1287_v32 = vadd.f32 %v1286_v27, %v1126_v35 }
 0x2a9   : > { %v1290_v50 = vpop.f32.mrf.mxu1 }
 0x2aa   : > { %v1291_v28 = vadd.f32 %v1290_v50, %v1131_v56  ;;  %v1101_v50 = vpop.permute.xlu1 %1100 }
 0x2ab   : > { %v1292_v29 = vpop.f32.mrf.mxu1 }
 0x2ac   : > { %v1293_v17 = vadd.f32 %v1292_v29, %v1131_v56  ;;  %v1277_v29 = vadd.f32 %v2716_v51, %v1116_v7 }
 0x2ad   : > { %v1294_v43 = vpop.f32.mrf.mxu1 }
 0x2ae   : > { %v1295_v59 = vadd.f32 %v1294_v43, %v1136_v62  ;;  %v1281_v43 = vadd.f32 %v1280_v52, %v1121_v2 }
 0x2af   : > { %v1296_v46 = vpop.f32.mrf.mxu1 }
 0x2b0   : > { %v1297_v6 = vadd.f32 %v1296_v46, %v1136_v62  ;;  %v1283_v46 = vadd.f32 %v1282_v24, %v1121_v2  ;;  %v1271_v24 = vadd.f32 %v2710_v21, %v1111_v26  ;;  %v1335_v62 = vmax.f32 %v1281_v43, 0.0 }
 0x2b1   : > { %v1300_v44 = vpop.f32.mrf.mxu1 }
 0x2b2   : > { %v1301_v34 = vadd.f32 %v1300_v44, %v1141_v53  ;;  %v1341_v44 = vmax.f32 %v1295_v59, 0.0 }
 0x2b3   : > { %v1302_v47 = vpop.f32.mrf.mxu1 }
 0x2b4   : > { %v1303_v4 = vadd.f32 %v1302_v47, %v1141_v53  ;;  %v1343_v31 = vmax.f32 %v1301_v34, 0.0  ;;  %v1340_v47 = vmax.f32 %v1293_v17, 0.0  ;;  %v1338_v53 = vmax.f32 %v1287_v32, 0.0 }
 0x2b5   : > { %v1304_v48 = vpop.f32.mrf.mxu1 }
 0x2b6   : > { %v1305_v3 = vadd.f32 %v1304_v48, %v1146_v41  ;;  %v1344_v14 = vmax.f32 %v1303_v4, 0.0  ;;  %v1339_v48 = vmax.f32 %v1291_v28, 0.0 }
 0x2b7   : > { %v1306_v42 = vpop.f32.mrf.mxu1 }
 0x2b8   : > { %v1307_v36 = vadd.f32 %v1306_v42, %v1146_v41  ;;  %v1345_v61 = vmax.f32 %v1305_v3, 0.0  ;;  %v1106_v41 = vpop.permute.xlu0 %1105  ;;  %v1275_v42 = vadd.f32 %v2714_v23, %v1116_v7  ;;  %v1263_v23 = vadd.f32 %v2704_v19, %v1101_v50 }
 0x2b9   : > { %v1310_v39 = vpop.f32.mrf.mxu1  ;;  %v1267_v52 = vadd.f32 %v2708_v49, %v1106_v41  ;;  %v1265_v56 = vadd.f32 %v2706_v20, %v1106_v41 }
 0x2ba   : > { %v1311_v58 = vadd.f32 %v1310_v39, %v1151_v54  ;;  %v1346_v30 = vmax.f32 %v1307_v36, 0.0  ;;  %v1336_v39 = vmax.f32 %v1283_v46, 0.0 }
 0x2bb   : > { %v1312_v63 = vpop.f32.mrf.mxu1 }
 0x2bc   : > { %v1313_v1 = vadd.f32 %v1312_v63, %v1151_v54  ;;  %v1347_v5 = vmax.f32 %v1311_v58, 0.0  ;;  %v1285_v54 = vadd.f32 %v1284_v25, %v1126_v35  ;;  %v1273_v25 = vadd.f32 %v2712_v22, %v1111_v26  ;;  %v1096_v51 = vpop.permute.xlu0 %1095  ;;  %v1091_v22 = vpop.permute.xlu1 %1090 }
 0x2bd   : > { %v1314_v40 = vpop.f32.mrf.mxu1  ;;  %v1334_v63 = vmax.f32 %v1277_v29, 0.0  ;;  %v1257_v21 = vadd.f32 %v2700_v16, %v1096_v51  ;;  %v1255_v49 = vadd.f32 %v2698_v60, %v1096_v51  ;;  %v1329_v35 = vmax.f32 %v1265_v56, 0.0 }
 0x2be   : > { %v1315_v0 = vadd.f32 %v1314_v40, %v1156_v45  ;;  %v1348_v57 = vmax.f32 %v1313_v1, 0.0  ;;  %v1337_v27 = vmax.f32 %v1285_v54, 0.0  ;;  %v1333_v40 = vmax.f32 %v1275_v42, 0.0 }
 0x2bf   : > { %v1316_v37 = vpop.f32.mrf.mxu1  ;;  %v1331_v1 = vmax.f32 %v1271_v24, 0.0  ;;  %v1253_v20 = vadd.f32 %v2696_v15, %v1091_v22  ;;  %v1328_v58 = vmax.f32 %v1263_v23, 0.0  ;;  %v1251_v36 = vadd.f32 %v2694_v13, %v1091_v22 }
 0x2c0   : > { %v1317_v55 = vadd.f32 %v1316_v37, %v1156_v45  ;;  %v1349_v33 = vmax.f32 %v1315_v0, 0.0  ;;  %v1342_v45 = vmax.f32 %v1297_v6, 0.0  ;;  %v1332_v0 = vmax.f32 %v1273_v25, 0.0  ;;  %v1086_v19 = vpop.permute.xlu0 %1085  ;;  %v1081_v16 = vpop.permute.xlu1 %1080 }
 0x2c1   : > { %v1261_v37 = vadd.f32 %v2702_v18, %v1101_v50  ;;  %v1247_v18 = vadd.f32 %v2692_v12, %v1086_v19  ;;  %v1326_v2 = vmax.f32 %v1257_v21, 0.0  ;;  %v1245_v3 = vadd.f32 %v2690_v11, %v1086_v19  ;;  %v1351_v11 = vld [vmem:[%s2814_s5] sm:$0xff] }
 0x2c2   : > { %v1350_v38 = vmax.f32 %v1317_v55, 0.0  ;;  %v1330_v55 = vmax.f32 %v1267_v52, 0.0  ;;  %v1243_v60 = vadd.f32 %v2688_v10, %v1081_v16  ;;  %v1324_v4 = vmax.f32 %v1253_v20, 0.0 }
 0x2c3   : > { %v1241_v15 = vadd.f32 %v2686_v9, %v1081_v16  ;;  %v1322_v13 = vmax.f32 %v1247_v18, 0.0  ;;  %v1321_v34 = vmax.f32 %v1245_v3, 0.0  ;;  %v1352_v9 = vld [vmem:[%s2814_s5 + $0x8] sm:$0xff] }
 0x2c4   : > { %1353 = vmatprep.subr.mxu0 %v1350_v38  ;;  %v1327_v38 = vmax.f32 %v1261_v37, 0.0  ;;  %v1320_v12 = vmax.f32 %v1243_v60, 0.0 }
 0x2c5   : > { %1354 = vmatpush1.msra.mxu0 %v1349_v33  ;;  %v1325_v33 = vmax.f32 %v1255_v49, 0.0 }
 0x2c6   : > { %1355 = vmatprep.subr.mxu0 %v1348_v57  ;;  %v1323_v57 = vmax.f32 %v1251_v36, 0.0 }
 0x2c7   : > { %1356 = vmatpush1.msra.mxu0 %v1347_v5  ;;  %v1319_v5 = vmax.f32 %v1241_v15, 0.0 }
 0x2c8   : > { %1357 = vmatprep.subr.mxu0 %v1346_v30 }
 0x2c9   : > { %1358 = vmatpush1.msra.mxu0 %v1345_v61 }
 0x2ca   : > { %1359 = vmatprep.subr.mxu0 %v1344_v14 }
 0x2cb   : > { %1360 = vmatpush1.msra.mxu0 %v1343_v31 }
 0x2cc   : > { %1361 = vmatprep.subr.mxu0 %v1342_v45 }
 0x2cd   : > { %1362 = vmatpush1.msra.mxu0 %v1341_v44 }
 0x2ce   : > { %1363 = vmatprep.subr.mxu0 %v1340_v47 }
 0x2cf   : > { %1364 = vmatpush1.msra.mxu0 %v1339_v48 }
 0x2d0   : > { %1365 = vmatprep.subr.mxu0 %v1338_v53 }
 0x2d1   : > { %1366 = vmatpush1.msra.mxu0 %v1337_v27 }
 0x2d2   : > { %1367 = vmatprep.subr.mxu0 %v1336_v39 }
 0x2d3   : > { %1368 = vmatpush1.msra.mxu0 %v1335_v62 }
 0x2d4   : > { %1369 = vmatprep.subr.mxu0 %v1334_v63 }
 0x2d5   : > { %1370 = vmatpush1.msra.mxu0 %v1333_v40 }
 0x2d6   : > { %1371 = vmatprep.subr.mxu0 %v1332_v0 }
 0x2d7   : > { %1372 = vmatpush1.msra.mxu0 %v1331_v1 }
 0x2d8   : > { %1373 = vmatprep.subr.mxu0 %v1330_v55 }
 0x2d9   : > { %1374 = vmatpush1.msra.mxu0 %v1329_v35 }
 0x2da   : > { %1375 = vmatprep.subr.mxu0 %v1328_v58 }
 0x2db   : > { %1376 = vmatpush1.msra.mxu0 %v1327_v38 }
 0x2dc   : > { %1377 = vmatprep.subr.mxu0 %v1326_v2 }
 0x2dd   : > { %1378 = vmatpush1.msra.mxu0 %v1325_v33 }
 0x2de   : > { %1379 = vmatprep.subr.mxu0 %v1324_v4 }
 0x2df   : > { %1380 = vmatpush1.msra.mxu0 %v1323_v57 }
 0x2e0   : > { %1381 = vmatprep.subr.mxu0 %v1322_v13 }
 0x2e1   : > { %1382 = vmatpush1.msra.mxu0 %v1321_v34 }
 0x2e2   : > { %1383 = vmatprep.subr.mxu0 %v1320_v12 }
 0x2e3   : > { %1384 = vmatpush1.msra.mxu0 %v1319_v5 }
 0x2e4   : > { %1418 = vmatmul.mubr.f32.vlgmr.msra.gmra.mxu0 %v1351_v11 }
 0x2e5   : > { %1423 = vmatprep.mubr.f32.mxu0 %v2065_v8 }
 0x2e8   : > { %1424 = vmatmul.mubr.f32.gmra.mxu0 %v1352_v9 }
 0x3a4   : > { %v1419_v10 = vpop.f32.mrf.mxu0 }
 0x3a5   : > { %1430 = vst [vmem:[%s684_s16] sm:$0xff] %v1419_v10 }
 0x3a6   : > { %v1421_v6 = vpop.f32.mrf.mxu0 }
 0x3a7   : > { %1431 = vst [vmem:[%s684_s16 + $0x8] sm:$0xff] %v1421_v6  ;;  %1441 = sbr.rel (!%p2143_p6) target bundleno = 968 (0x3c8), region = 114 }
 0x3a8   : > { %v1425_v30 = vpop.f32.mrf.mxu0 }
 0x3a9   : > { %1432 = vst [vmem:[%s684_s16 + $0x10] sm:$0xff] %v1425_v30 }
 0x3aa   : > { %v1427_v7 = vpop.f32.mrf.mxu0 }
 0x3ab   : > { %1433 = vst [vmem:[%s684_s16 + $0x18] sm:$0xff] %v1427_v7 }
 0x3ac   : > { %s2850_s28 = smov (!%p1444_p7, %s1443_s28), 2 }
 0x3ad   : > { %s2749_s0 = sshll.u32 %s2850_s28, 8 }
 0x3ae   : > { %s1448_s14 = ssub.s32 512, %s2749_s0 }
 0x3af   : > { %1449 = vsyncadd %s1435_s19, %s1448_s14  ;;  %p1667_p6 = scmp.ne.s32.totalorder %s2749_s0, 0  ;;  %s1679_s7 = sshll.u32 %s2125_s25, 8 }
 0x3b0   : > { %s2759_s15 = scalar_lea.hbm %s2815_s6, %s1679_s7  ;;  %s1669_s11 = sshll.u32 %s2850_s28, 3 }
 0x3b1   : > { %s1455_s9 = sshll.u32 %s684_s16, 4  ;;  %s2066_s26 = smov [#allocation3]   ;;  %s2762_s9 = int_to_ptr.vmem [resolvable:$true] %s1455_s9 }
 0x3b2   : > { %s1872_s12 = scalar_lea.vmem %s2762_s9, %s2749_s0  ;;  %s1876_s23 = sshll.u32 %s2066_s26, 4  ;;  %s1877_s23 = int_to_ptr.vmem [resolvable:$false] %s1876_s23 }
 0x3b3   : > { %p1873_p10 = scmp.ne.s32.totalorder %s2762_s9, %s1872_s12  ;;  %s1878_s25 = scalar_lea.vmem %s1877_s23, 1024 }
 0x3b4   : > { %p1879_p13 = scmp.lt.s32.totalorder %s2762_s9, %s1877_s23  ;;  %p1880_p0 = scmp.lt.s32.totalorder %s1878_s25, %s1872_s12 }
 0x3b5   : > { %p1874_p11 = pnand %p1873_p10, %p1667_p6 }
 0x3b6   : > { %p1881_p1 = por %p1880_p0, %p1879_p13 }
 0x3b7   : > { %p1875_p12 = pneg %p1874_p11 }
 0x3b9   : > { %p1882_p2 = pnand %p1881_p1, %p1875_p12 }
 0x3bb   : > { %1885 = shalt.err (!%p1882_p2)
}
 0x3bc   : > { %s1886_s30 = scalar_lea.hbm %s2759_s15, %s2749_s0  ;;  %s1890_s16 = scalar_lea.hbm %s2815_s6, 768 }
 0x3bd   : > { %p1887_p3 = scmp.ne.s32.totalorder %s2759_s15, %s1886_s30  ;;  %p1891_p7 = scmp.lt.s32.totalorder %s2759_s15, %s2815_s6 }
 0x3be   : > { %p1892_p10 = scmp.lt.s32.totalorder %s1890_s16, %s1886_s30 }
 0x3bf   : > { %p1888_p4 = pnand %p1887_p3, %p1667_p6 }
 0x3c0   : > { %p1893_p11 = por %p1892_p10, %p1891_p7 }
 0x3c1   : > { %p1889_p5 = pneg %p1888_p4 }
 0x3c3   : > { %p1894_p12 = pnand %p1893_p11, %p1889_p5 }
 0x3c5   : > { %1897 = shalt.err (!%p1894_p12)
}
 0x3c6   : > { %s2067_s7 = smov 256   ;;  %s2068_s13 = smov 384  }
 0x3c7   : > { %1461 = dma.vmem_to_hbm [thread:$0]  (%p1667_p6), %s2762_s9, %s2749_s0, %s2759_s15, %s1435_s19, %s2067_s7, %s2068_s13, %s1669_s11  }
 0x3c8 PF: > { %s1470_s29 = sand.u32 1, %s1984_s21   ;;  %p1684_p13 = pnand %p1607_p9, %p2147_p8 }
 0x3c9   : > { %s1471_s12 = scalar_lea.sflag [#allocation4], %s1470_s29 }
 0x3ca   : > { %p1685_p0 = pneg %p1684_p13 }
 0x3cc   : > { %1979 = dma.done.wait (%p1685_p0), %s1471_s12, 512  }
 0x3cd   : > { %1981 = vsyncadd (%p1685_p0), %s1471_s12, 4294966784  ;;  %s2834_s26 = sld [smem:[#allocation6_spill]]  ;;  %p16_p1 = scmp.ge.s32.totalorder %s2129_s27, 4  }
 0x3ce   : > { %s2835_s23 = sld [smem:[#allocation7_spill]]  ;;  %s2836_s21 = smov %s1988_s22 }
 0x3cf   : > { %s2838_s24 = smov %s2129_s27  ;;  %18 = sbr.rel (!%p16_p1) target bundleno = 5 (0x5), region = 212 }
 0x3d3   : > { %s2837_s22 = smov %s2834_s26 }
 0x3d4   :  { %1476 = vsyncpa [#allocation4], 1 }
 0x3d5   :  { %1478 = vsyncpa [#allocation4 + $0x1], 1 }

</bundles_post_ra>
